<compile_context>
chip_gen: v7x
topology: tpu7x:2x2x1
jax: 0.10.0
libtpu: 0.0.40
codegen_flags: <defaults>
</compile_context>

<pallas_src>
import jax
import jax.numpy as jnp
from jax.experimental import pallas as pl
from jax.experimental.pallas import tpu as pltpu


def _round_up(v, m):
    return (v + m - 1) // m * m


# ----------------------------------------------------------------------------
# Pallas kernel: per-graph fused GCN x2 -> max-pool -> fc0 -> fc1(relu) -> fc2
# ----------------------------------------------------------------------------
def _make_kernel(input_size, h1, h2, emb, hid, nc, out_pad):
    # static column offsets shared by the packed weight slab and the bias row
    o0 = 0
    o1 = o0 + h1
    o2 = o1 + h2
    o3 = o2 + emb
    o4 = o3 + hid
    o5 = o4 + nc

    def kernel(ahat_ref, x_ref, w_ref, b_ref, out_ref):
        f32, bf16 = jnp.float32, jnp.bfloat16
        ahat = ahat_ref[0]            # [N, N]   bf16  (this graph)
        x = x_ref[0]                  # [N, F]   bf16  (this graph)
        w = w_ref[...]                # [R, WPAD] bf16, packed weights (resident)
        b = b_ref[...]                # [1, WPAD] f32,  packed biases  (resident)

        # static slices out of the packed slabs
        w1 = w[:input_size, o0:o1]
        w2 = w[:h1, o1:o2]
        w0 = w[:h2, o2:o3]
        wf1 = w[:emb, o3:o4]
        wf2 = w[:hid, o4:o5]
        b1, b2, b0, bf1, bf2 = (b[:, o0:o1], b[:, o1:o2], b[:, o2:o3],
                                b[:, o3:o4], b[:, o4:o5])

        # GCNConv 1: relu( Ahat @ X @ W1 + b1 )
        ax = jnp.dot(ahat, x, preferred_element_type=f32)
        g1 = jnp.dot(ax.astype(bf16), w1, preferred_element_type=f32) + b1
        g1 = jnp.maximum(g1, 0.0)                         # [N, h1]

        # GCNConv 2: relu( Ahat @ H1 @ W2 + b2 )
        ag = jnp.dot(ahat, g1.astype(bf16), preferred_element_type=f32)
        g2 = jnp.dot(ag.astype(bf16), w2, preferred_element_type=f32) + b2
        g2 = jnp.maximum(g2, 0.0)                         # [N, h2]

        # Global max pool over nodes (torch.max(x, dim=0)[0])
        gmax = jnp.max(g2, axis=0, keepdims=True)         # [1, h2]

        # fc0 -> embedding
        e = jnp.dot(gmax.astype(bf16), w0, preferred_element_type=f32) + b0

        # fc1 + relu, fc2 -> logits
        hvec = jnp.maximum(
            jnp.dot(e.astype(bf16), wf1, preferred_element_type=f32) + bf1, 0.0)
        logits = jnp.dot(hvec.astype(bf16), wf2, preferred_element_type=f32) + bf2

        # single lane-dense store: [ embedding | logits | zero pad ]
        out_ref[0] = jnp.concatenate(
            [e, logits, jnp.zeros((1, out_pad - (emb + nc)), f32)], axis=-1)

    return kernel


# ----------------------------------------------------------------------------
# Parameter packing (2 DMAs instead of 10)
# ----------------------------------------------------------------------------
def pack_params(params):
    (w1, b1, w2, b2, w0, b0, wf1, bf1, wf2, bf2) = params
    weights = [w1, w2, w0, wf1, wf2]
    biases = [b1, b2, b0, bf1, bf2]
    rows = _round_up(max(w.shape[0] for w in weights), 8)
    cols = sum(w.shape[1] for w in weights)
    wpad = _round_up(cols, 128)
    wslab = jnp.zeros((rows, wpad), jnp.float32)
    brow = jnp.zeros((1, wpad), jnp.float32)
    c = 0
    for wgt, bia in zip(weights, biases):
        r, k = wgt.shape
        wslab = wslab.at[:r, c:c + k].set(wgt.astype(jnp.float32))
        brow = brow.at[:, c:c + k].set(jnp.reshape(bia, (1, -1)).astype(jnp.float32))
        c += k
    return wslab.astype(jnp.bfloat16), brow


# ----------------------------------------------------------------------------
# JAX glue
# ----------------------------------------------------------------------------
def build_gcn_adjacency(edge_index, num_nodes):
    """Dense normalized adjacency matching PyG GCNConv (add_self_loops=True)."""
    src = edge_index[0]
    dst = edge_index[1]
    loop = jnp.arange(num_nodes, dtype=edge_index.dtype)
    src = jnp.concatenate([src, loop])
    dst = jnp.concatenate([dst, loop])
    w = jnp.ones(src.shape[0], dtype=jnp.float32)
    deg = jnp.zeros((num_nodes,), jnp.float32).at[dst].add(w)
    dinv = jnp.where(deg > 0, 1.0 / jnp.sqrt(deg), 0.0)
    norm = dinv[src] * dinv[dst]
    # message flows src -> dst, aggregated at dst:  Ahat[dst, src] = norm
    ahat = jnp.zeros((num_nodes, num_nodes), jnp.float32).at[dst, src].add(norm)
    return ahat


def contrastive_and_classification_forward_batched(features_b, ahat_b, params):
    """features_b: [B, N, F], ahat_b: [B, N, N].  Returns ([B, emb], [B, nc])."""
    features_b = jnp.asarray(features_b, jnp.float32)
    ahat_b = jnp.asarray(ahat_b, jnp.float32)
    B, N, F = features_b.shape

    (w1, _, w2, _, w0, _, wf1, _, wf2, _) = params
    input_size, h1 = w1.shape
    h2 = w2.shape[1]
    emb = w0.shape[1]
    hid = wf1.shape[1]
    nc = wf2.shape[1]
    out_pad = _round_up(emb + nc, 128)

    wslab, brow = pack_params(params)
    a_bf = ahat_b.astype(jnp.bfloat16)
    x_bf = features_b.astype(jnp.bfloat16)

    kernel = _make_kernel(input_size, h1, h2, emb, hid, nc, out_pad)

    out = pl.pallas_call(
        kernel,
        out_shape=jax.ShapeDtypeStruct((B, 1, out_pad), jnp.float32),
        grid=(B,),
        in_specs=[
            pl.BlockSpec((1, N, N), lambda b: (b, 0, 0)),     # Ahat, per graph
            pl.BlockSpec((1, N, F), lambda b: (b, 0, 0)),     # X, per graph
            pl.BlockSpec(wslab.shape, lambda b: (0, 0)),      # packed weights (resident)
            pl.BlockSpec(brow.shape, lambda b: (0, 0)),       # packed biases  (resident)
        ],
        out_specs=pl.BlockSpec((1, 1, out_pad), lambda b: (b, 0, 0)),
        compiler_params=pltpu.CompilerParams(
            dimension_semantics=("parallel",)),               # shard batch over v7x TCs
    )(a_bf, x_bf, wslab, brow)

    emb_out = out[:, 0, :emb]
    logits_out = out[:, 0, emb:emb + nc]
    return emb_out, logits_out


def _canonicalize_features(features):
    """Mirror of the torch module's squeeze handling."""
    features = jnp.asarray(features)
    if features.ndim > 2 and features.shape[0] == 1:
        features = features[0]                      # torch .squeeze(0)
    if features.ndim > 2:
        features = jnp.squeeze(features)            # torch .squeeze() (all size-1 dims)
    if features.ndim == 1:
        features = features[None, :]
    return features.astype(jnp.float32)


def contrastive_and_classification_forward(features, edge_index, params):
    """Single-graph API: returns (x_embedding [emb], logits [n_classes])."""
    features = _canonicalize_features(features)
    n = features.shape[0]
    ahat = build_gcn_adjacency(edge_index, n)
    e, logits = contrastive_and_classification_forward_batched(
        features[None], ahat[None], params)
    return e[0], logits[0]


def init_params(key, input_size, hidden1, hidden2, embedding_size, hidden, n_classes):
    """Deterministic synthetic parameters (shapes mirror the torch module)."""
    ks = jax.random.split(key, 10)

    def dense(k, fan_in, fan_out):
        scale = 1.0 / jnp.sqrt(jnp.float32(fan_in))
        return jax.random.uniform(k, (fan_in, fan_out), jnp.float32, -scale, scale)

    w1 = dense(ks[0], input_size, hidden1)            # GCNConv1 weight
    b1 = jnp.zeros((1, hidden1), jnp.float32)         # GCNConv bias init is zeros
    w2 = dense(ks[1], hidden1, hidden2)               # GCNConv2 weight
    b2 = jnp.zeros((1, hidden2), jnp.float32)
    w0 = dense(ks[2], hidden2, embedding_size)        # fc0
    b0 = dense(ks[3], hidden2, embedding_size)[0:1, :] * 0.1
    wf1 = dense(ks[4], embedding_size, hidden)        # fc1
    bf1 = dense(ks[5], embedding_size, hidden)[0:1, :] * 0.1
    wf2 = dense(ks[6], hidden, n_classes)             # fc2
    bf2 = dense(ks[7], hidden, n_classes)[0:1, :] * 0.1
    return (w1, b1, w2, b2, w0, b0, wf1, bf1, wf2, bf2)


# ----------------------------------------------------------------------------
# Pure-JAX reference (operands rounded to bf16 like the kernel, f32 accumulate)
# ----------------------------------------------------------------------------
def _bf16_mm(a, b):
    a = a.astype(jnp.bfloat16).astype(jnp.float32)
    b = b.astype(jnp.bfloat16).astype(jnp.float32)
    return jnp.dot(a, b, preferred_element_type=jnp.float32)


def reference_forward(features, edge_index, params):
    (w1, b1, w2, b2, w0, b0, wf1, bf1, wf2, bf2) = params
    features = features.astype(jnp.float32)
    ahat = build_gcn_adjacency(edge_index, features.shape[0])
    g1 = jax.nn.relu(_bf16_mm(_bf16_mm(ahat, features), w1) + b1)
    g2 = jax.nn.relu(_bf16_mm(_bf16_mm(ahat, g1), w2) + b2)
    g = jnp.max(g2, axis=0, keepdims=True)
    e = _bf16_mm(g, w0) + b0
    h = jax.nn.relu(_bf16_mm(e, wf1) + bf1)
    logits = _bf16_mm(h, wf2) + bf2
    return e[0], logits[0]


if __name__ == "__main__":
    # Small shapes consistent with the module's forward
    B = 4                 # graphs per batched kernel call
    N = 8                 # nodes per graph
    input_size = 16
    hidden1 = 32
    hidden2 = 32
    embedding_size = 16
    hidden = 32
    n_classes = 4

    key = jax.random.PRNGKey(0)
    k_feat, k_params = jax.random.split(key)

    features_b = jax.random.normal(k_feat, (B, N, input_size), jnp.float32)

    # B ring-like graphs with different strides (both directions, PyG convention)
    edge_list = []
    base = jnp.arange(N, dtype=jnp.int32)
    for b in range(B):
        dst = (base + b + 1) % N
        edge_list.append(jnp.stack([jnp.concatenate([base, dst]),
                                    jnp.concatenate([dst, base])], axis=0))
    edge_index_b = jnp.stack(edge_list, axis=0)        # [B, 2, 2N]

    params = init_params(k_params, input_size, hidden1, hidden2,
                         embedding_size, hidden, n_classes)

    # Batched path: one pallas_call for all B graphs
    ahat_b = jax.vmap(build_gcn_adjacency, in_axes=(0, None))(edge_index_b, N)
    emb_b, logits_b = contrastive_and_classification_forward_batched(
        features_b, ahat_b, params)
    emb_b, logits_b = jax.block_until_ready((emb_b, logits_b))

    assert emb_b.shape == (B, embedding_size)
    assert logits_b.shape == (B, n_classes)
    for b in range(B):
        ref_e, ref_l = reference_forward(features_b[b], edge_index_b[b], params)
        assert jnp.allclose(emb_b[b], ref_e, atol=5e-3, rtol=5e-3)
        assert jnp.allclose(logits_b[b], ref_l, atol=5e-3, rtol=5e-3)

    # Single-graph API (same semantics as the torch forward)
    emb0, logits0 = contrastive_and_classification_forward(
        features_b[0], edge_index_b[0], params)
    emb0, logits0 = jax.block_until_ready((emb0, logits0))
    assert emb0.shape == (embedding_size,)
    assert logits0.shape == (n_classes,)
    ref_e0, ref_l0 = reference_forward(features_b[0], edge_index_b[0], params)
    assert jnp.allclose(emb0, ref_e0, atol=5e-3, rtol=5e-3)
    assert jnp.allclose(logits0, ref_l0, atol=5e-3, rtol=5e-3)

    print("KERNEL_OK")
</pallas_src>

<mosaic_0001>
module attributes {stable_mosaic.version = 11 : i64} {
  func.func @kernel(%arg0: i32, %arg1: memref<1x8x8xbf16, #tpu.memory_space<vmem>>, %arg2: memref<1x8x16xbf16, #tpu.memory_space<vmem>>, %arg3: memref<32x128xbf16, #tpu.memory_space<vmem>>, %arg4: memref<1x128xf32, #tpu.memory_space<vmem>>, %arg5: memref<1x1x128xf32, #tpu.memory_space<vmem>>) attributes {dimension_semantics = [#tpu.dimension_semantics<parallel>], iteration_bounds = array<i64: 4>, scalar_prefetch = 0 : i64, scratch_operands = 0 : i64, tpu.core_type = #tpu.core_type<tc>, window_params = [{transform_indices = @transform_0, window_bounds = array<i64: 1, 8, 8>}, {transform_indices = @transform_1, window_bounds = array<i64: 1, 8, 16>}, {pipeline_mode = #tpu.pipeline_mode<synchronous>, transform_indices = @transform_2, window_bounds = array<i64: 32, 128>}, {pipeline_mode = #tpu.pipeline_mode<synchronous>, transform_indices = @transform_3, window_bounds = array<i64: 1, 128>}, {transform_indices = @transform_4, window_bounds = array<i64: 1, 1, 128>}]} {
    %c0 = arith.constant 0 : index
    %c0_0 = arith.constant 0 : index
    %c0_1 = arith.constant 0 : index
    %0 = vector.load %arg1[%c0, %c0_0, %c0_1] : memref<1x8x8xbf16, #tpu.memory_space<vmem>>, vector<1x8x8xbf16>
    %1 = vector.shape_cast %0 : vector<1x8x8xbf16> to vector<8x8xbf16>
    %c0_2 = arith.constant 0 : index
    %c0_3 = arith.constant 0 : index
    %c0_4 = arith.constant 0 : index
    %2 = vector.load %arg2[%c0_2, %c0_3, %c0_4] : memref<1x8x16xbf16, #tpu.memory_space<vmem>>, vector<1x8x16xbf16>
    %3 = vector.shape_cast %2 : vector<1x8x16xbf16> to vector<8x16xbf16>
    %c0_5 = arith.constant 0 : index
    %c0_6 = arith.constant 0 : index
    %4 = vector.load %arg3[%c0_5, %c0_6] : memref<32x128xbf16, #tpu.memory_space<vmem>>, vector<32x128xbf16>
    %c0_7 = arith.constant 0 : index
    %c0_8 = arith.constant 0 : index
    %5 = vector.load %arg4[%c0_7, %c0_8] : memref<1x128xf32, #tpu.memory_space<vmem>>, vector<1x128xf32>
    %6 = vector.extract_strided_slice %4 {offsets = [0, 0], sizes = [16, 32], strides = [1, 1]} : vector<32x128xbf16> to vector<16x32xbf16>
    %7 = vector.extract_strided_slice %4 {offsets = [0, 32], sizes = [32, 32], strides = [1, 1]} : vector<32x128xbf16> to vector<32x32xbf16>
    %8 = vector.extract_strided_slice %4 {offsets = [0, 64], sizes = [32, 16], strides = [1, 1]} : vector<32x128xbf16> to vector<32x16xbf16>
    %9 = vector.extract_strided_slice %4 {offsets = [0, 80], sizes = [16, 32], strides = [1, 1]} : vector<32x128xbf16> to vector<16x32xbf16>
    %10 = vector.extract_strided_slice %4 {offsets = [0, 112], sizes = [32, 4], strides = [1, 1]} : vector<32x128xbf16> to vector<32x4xbf16>
    %11 = vector.extract_strided_slice %5 {offsets = [0, 0], sizes = [1, 32], strides = [1, 1]} : vector<1x128xf32> to vector<1x32xf32>
    %12 = vector.extract_strided_slice %5 {offsets = [0, 32], sizes = [1, 32], strides = [1, 1]} : vector<1x128xf32> to vector<1x32xf32>
    %13 = vector.extract_strided_slice %5 {offsets = [0, 64], sizes = [1, 16], strides = [1, 1]} : vector<1x128xf32> to vector<1x16xf32>
    %14 = vector.extract_strided_slice %5 {offsets = [0, 80], sizes = [1, 32], strides = [1, 1]} : vector<1x128xf32> to vector<1x32xf32>
    %15 = vector.extract_strided_slice %5 {offsets = [0, 112], sizes = [1, 4], strides = [1, 1]} : vector<1x128xf32> to vector<1x4xf32>
    %cst = arith.constant dense<0.000000e+00> : vector<8x16xf32>
    %16 = tpu.matmul %1, %3, %cst {dimension_numbers = #tpu.dot_dimension_numbers<[1], [0], [0], [1], [0, 0, 1, 1], [], []>} : vector<8x8xbf16>, vector<8x16xbf16>, vector<8x16xf32> -> vector<8x16xf32>
    %17 = arith.truncf %16 : vector<8x16xf32> to vector<8x16xbf16>
    %cst_9 = arith.constant dense<0.000000e+00> : vector<8x32xf32>
    %18 = tpu.matmul %17, %6, %cst_9 {dimension_numbers = #tpu.dot_dimension_numbers<[1], [0], [0], [1], [0, 0, 1, 1], [], []>} : vector<8x16xbf16>, vector<16x32xbf16>, vector<8x32xf32> -> vector<8x32xf32>
    %19 = vector.broadcast %11 : vector<1x32xf32> to vector<8x32xf32>
    %20 = arith.addf %18, %19 : vector<8x32xf32>
    %cst_10 = arith.constant 0.000000e+00 : f32
    %21 = vector.broadcast %cst_10 : f32 to vector<8x32xf32>
    %22 = arith.maximumf %20, %21 : vector<8x32xf32>
    %23 = arith.truncf %22 : vector<8x32xf32> to vector<8x32xbf16>
    %cst_11 = arith.constant dense<0.000000e+00> : vector<8x32xf32>
    %24 = tpu.matmul %1, %23, %cst_11 {dimension_numbers = #tpu.dot_dimension_numbers<[1], [0], [0], [1], [0, 0, 1, 1], [], []>} : vector<8x8xbf16>, vector<8x32xbf16>, vector<8x32xf32> -> vector<8x32xf32>
    %25 = arith.truncf %24 : vector<8x32xf32> to vector<8x32xbf16>
    %cst_12 = arith.constant dense<0.000000e+00> : vector<8x32xf32>
    %26 = tpu.matmul %25, %7, %cst_12 {dimension_numbers = #tpu.dot_dimension_numbers<[1], [0], [0], [1], [0, 0, 1, 1], [], []>} : vector<8x32xbf16>, vector<32x32xbf16>, vector<8x32xf32> -> vector<8x32xf32>
    %27 = vector.broadcast %12 : vector<1x32xf32> to vector<8x32xf32>
    %28 = arith.addf %26, %27 : vector<8x32xf32>
    %cst_13 = arith.constant 0.000000e+00 : f32
    %29 = vector.broadcast %cst_13 : f32 to vector<8x32xf32>
    %30 = arith.maximumf %28, %29 : vector<8x32xf32>
    %cst_14 = arith.constant dense<0xFF800000> : vector<32xf32>
    %31 = vector.multi_reduction <maximumf>, %30, %cst_14 [0] : vector<8x32xf32> to vector<32xf32>
    %32 = vector.shape_cast %31 : vector<32xf32> to vector<1x32xf32>
    %33 = arith.truncf %32 : vector<1x32xf32> to vector<1x32xbf16>
    %cst_15 = arith.constant dense<0.000000e+00> : vector<1x16xf32>
    %34 = tpu.matmul %33, %8, %cst_15 {dimension_numbers = #tpu.dot_dimension_numbers<[1], [0], [0], [1], [0, 0, 1, 1], [], []>} : vector<1x32xbf16>, vector<32x16xbf16>, vector<1x16xf32> -> vector<1x16xf32>
    %35 = arith.addf %34, %13 : vector<1x16xf32>
    %36 = arith.truncf %35 : vector<1x16xf32> to vector<1x16xbf16>
    %cst_16 = arith.constant dense<0.000000e+00> : vector<1x32xf32>
    %37 = tpu.matmul %36, %9, %cst_16 {dimension_numbers = #tpu.dot_dimension_numbers<[1], [0], [0], [1], [0, 0, 1, 1], [], []>} : vector<1x16xbf16>, vector<16x32xbf16>, vector<1x32xf32> -> vector<1x32xf32>
    %38 = arith.addf %37, %14 : vector<1x32xf32>
    %cst_17 = arith.constant 0.000000e+00 : f32
    %39 = vector.broadcast %cst_17 : f32 to vector<1x32xf32>
    %40 = arith.maximumf %38, %39 : vector<1x32xf32>
    %41 = arith.truncf %40 : vector<1x32xf32> to vector<1x32xbf16>
    %cst_18 = arith.constant dense<0.000000e+00> : vector<1x4xf32>
    %42 = tpu.matmul %41, %10, %cst_18 {dimension_numbers = #tpu.dot_dimension_numbers<[1], [0], [0], [1], [0, 0, 1, 1], [], []>} : vector<1x32xbf16>, vector<32x4xbf16>, vector<1x4xf32> -> vector<1x4xf32>
    %43 = arith.addf %42, %15 : vector<1x4xf32>
    %cst_19 = arith.constant 0.000000e+00 : f32
    %44 = vector.broadcast %cst_19 : f32 to vector<1x108xf32>
    %45 = tpu.concatenate %35, %43, %44 in 1 : vector<1x16xf32>, vector<1x4xf32>, vector<1x108xf32> -> vector<1x128xf32>
    %c0_20 = arith.constant 0 : index
    %c0_21 = arith.constant 0 : index
    %c0_22 = arith.constant 0 : index
    %46 = vector.load %arg5[%c0_20, %c0_21, %c0_22] : memref<1x1x128xf32, #tpu.memory_space<vmem>>, vector<1x1x128xf32>
    %47 = vector.shape_cast %46 : vector<1x1x128xf32> to vector<1x128xf32>
    %48 = vector.shape_cast %45 : vector<1x128xf32> to vector<1x1x128xf32>
    tpu.vector_store %arg5[%c0_20, %c0_21, %c0_22], %48 {strides = array<i32>} : memref<1x1x128xf32, #tpu.memory_space<vmem>>, vector<1x1x128xf32>,
    return
  }
  func.func @transform_0(%arg0: i32) -> (i32, i32, i32) {
    %c0_i32 = arith.constant 0 : i32
    %c0_i32_0 = arith.constant 0 : i32
    %c0_i32_1 = arith.constant 0 : i32
    return %arg0, %c0_i32, %c0_i32_0 : i32, i32, i32
  }
  func.func @transform_1(%arg0: i32) -> (i32, i32, i32) {
    %c0_i32 = arith.constant 0 : i32
    %c0_i32_0 = arith.constant 0 : i32
    %c0_i32_1 = arith.constant 0 : i32
    return %arg0, %c0_i32, %c0_i32_0 : i32, i32, i32
  }
  func.func @transform_2(%arg0: i32) -> (i32, i32) {
    %c0_i32 = arith.constant 0 : i32
    %c0_i32_0 = arith.constant 0 : i32
    %c0_i32_1 = arith.constant 0 : i32
    return %c0_i32, %c0_i32_0 : i32, i32
  }
  func.func @transform_3(%arg0: i32) -> (i32, i32) {
    %c0_i32 = arith.constant 0 : i32
    %c0_i32_0 = arith.constant 0 : i32
    %c0_i32_1 = arith.constant 0 : i32
    return %c0_i32, %c0_i32_0 : i32, i32
  }
  func.func @transform_4(%arg0: i32) -> (i32, i32, i32) {
    %c0_i32 = arith.constant 0 : i32
    %c0_i32_0 = arith.constant 0 : i32
    %c0_i32_1 = arith.constant 0 : i32
    return %arg0, %c0_i32, %c0_i32_0 : i32, i32, i32
  }
}

</mosaic_0001>

<bundles_post_ra>
// kernel: tpu_custom_call.1
= control target key start
LH: loop header
LB: loop body
LE: loop exit
PB: predicated region body
PF: predicated region fallthrough
CT: control target
= control target key end

     0   :  { %s1410_s0 = inlined_call_operand.hbm [shape: bf16[4,8,8], index: 0, kind: input, shape index: {}]   ;;  %s1411_s1 = inlined_call_operand.hbm [shape: bf16[4,8,16], index: 1, kind: input, shape index: {}]   ;;  %s1412_s2 = inlined_call_operand.hbm [shape: bf16[32,128], index: 2, kind: input, shape index: {}]   ;;  %s1413_s3 = inlined_call_operand.vmem [shape: f32[1,128], index: 3, kind: input, shape index: {}]   ;;  %s1414_s4 = inlined_call_operand.hbm [shape: f32[4,1,128], index: 4, kind: output, shape index: {}]  }
   0x1   :  { %1419 = sst [smem:[#allocation13_spill]] %s1412_s2 }
   0x2   :  { %9 = vsyncpa [#allocation3], 0 }
   0x3   :  { %11 = vsyncpa [#allocation3 + $0x1], 0 }
   0x4   :  { %12 = vsyncpa [#allocation6], 0 }
   0x5   :  { %14 = vsyncpa [#allocation6 + $0x1], 0 }
   0x6   :  { %15 = vsyncpa [#allocation4], 0 }
   0x7   :  { %17 = vsyncpa [#allocation4 + $0x1], 0  ;;  %s1127_s15 = smov 0   ;;  %s1129_s16 = smov 0  }
   0x8   :  { %s1131_s17 = smov 0   ;;  %s1133_s18 = smov 0  }
   0x9 LB: > { %s1148_s19 = sadd.s32 4294967295, %s1088_s18   ;;  %s764_s20 = sadd.s32 4294967294, %s1088_s18   ;;  %s1088_s18 = sphi %s1133_s18, %s1437_s18   ;;  %s1084_s17 = sphi %s1131_s17, %s1436_s17   ;;  %s1080_s16 = sphi %s1129_s16, %s1435_s16   ;;  %s1076_s15 = sphi %s1127_s15, %s1434_s15  }
   0xa   : > { %p43_p0 = scmp.ne.s32.totalorder %s1080_s16, %s1076_s15  ;;  %p1415_p1 = scmp.eq.s32.totalorder %s1148_s19, 0 }
   0xb   : > { %p141_p3 = scmp.eq.s32.totalorder %s764_s20, 3  ;;  %p765_p5 = scmp.ge.s32.totalorder %s1088_s18, 1 }
   0xc   : > { %p1157_p4 = por %p1415_p1, %p43_p0  ;;  %p148_p7 = scmp.lt.s32.totalorder %s1088_s18, 5 }
   0xd   : > { %p1162_p6 = por %p141_p3, %p43_p0  ;;  %s1090_s24 = smov [#allocation7]  }
   0xe   : > { %s1420_s21 = scalar_select %p1157_p4, 1, 0 }
   0xf   : > { %s1421_s22 = scalar_select %p1162_p6, 1, 0 }
  0x10   : > { %p1167_p8 = pnand %p765_p5, %p148_p7  ;;  %s160_s25 = sshll.u32 %s1090_s24, 4  ;;  %s161_s25 = int_to_ptr.vmem [resolvable:$true] %s160_s25 }
  0x11   : > { %s1180_s27 = sadd.s32 1, %s1088_s18   ;;  %s30_s28 = sadd.s32 1, %s1084_s17 }
  0x12   : > { %s1422_s23 = scalar_select %p1167_p8, 1, 0 }
  0x13   : > { %p864_p9 = pneg %p1167_p8  ;;  %s27_s29 = ssub.s32 %s1088_s18, %s1180_s27 }
  0x14   : > { %s1424_s2 = sld [smem:[#allocation13_spill]] }
  0x15   : > { %p1175_p10 = pnand %p864_p9, %p1415_p1 }
  0x17   : > { %p928_p12 = pneg %p1175_p10 }
  0x1a   : > { %s926_s6 = scalar_lea.hbm %s1424_s2, 256 }
  0x1b   : > { %p927_p11 = scmp.ne.s32.totalorder %s1424_s2, %s926_s6  ;;  %p933_p3 = scmp.lt.u32.totalorder %s926_s6, %s1424_s2 }
  0x1d   : > { %p929_p13 = pnand %p928_p12, %p927_p11 }
  0x1f   : > { %p930_p0 = pneg %p929_p13 }
  0x21   : > { %p935_p5 = pnand %p933_p3, %p930_p0 }
  0x23   : > { %938 = shalt.err (!%p935_p5)
}
  0x24   : > { %s939_s11 = scalar_lea.vmem %s161_s25, 256  ;;  %p947_p2 = scmp.lt.s32.totalorder %s161_s25, %s161_s25 }
  0x25   : > { %p940_p7 = scmp.ne.s32.totalorder %s161_s25, %s939_s11  ;;  %p948_p6 = scmp.lt.s32.totalorder %s939_s11, %s939_s11 }
  0x27   : > { %p942_p9 = pnand %p940_p7, %p928_p12  ;;  %p949_p4 = por %p948_p6, %p947_p2 }
  0x29   : > { %p943_p1 = pneg %p942_p9 }
  0x2b   : > { %p950_p8 = pnand %p949_p4, %p943_p1 }
  0x2d   : > { %953 = shalt.err (!%p950_p8)
}
  0x2e   : > { %s1091_s12 = smov 64   ;;  %s1092_s13 = smov 4  }
  0x2f   : > { %867 = dma.hbm_to_vmem [thread:$0]  (!%p1175_p10), %s1424_s2, 256, %s161_s25, [#allocation6], %s1091_s12, %s1091_s12, %s1092_s13  }
  0x30   : > { %p28_p11 = scmp.eq.s32.totalorder %s27_s29, 0  ;;  %p37_p2 = scmp.ne.s32.totalorder %s1084_s17, %s1080_s16 }
  0x31   : > { %p38_p1 = scmp.eq.s32.totalorder %s1088_s18, 0  ;;  %p880_p4 = scmp.lt.s32.totalorder %s1088_s18, 4 }
  0x32   : > { %s1206_s24 = scalar_select %p28_p11, %s1084_s17, %s30_s28  }
  0x33   : > { %p39_p6 = por %p38_p1, %p37_p2  ;;  %p1425_p8 = scmp.eq.s32.totalorder %s1148_s19, 3 }
  0x34   : > { %s177_s5 = sand.u32 1, %s1084_s17   ;;  %s769_s6 = sshll.u32 %s1088_s18, 6 }
  0x35   : > { %p1210_p12 = por %p1425_p8, %p37_p2  ;;  %s1216_s7 = sshll.u32 %s177_s5, 2 }
  0x36   : > { %s1221_s25 = scalar_lea.hbm %s1410_s0, %s769_s6  ;;  %s181_s28 = scalar_lea.vmem [#allocation2], %s1216_s7 }
  0x37   : > { %s1426_s30 = scalar_select %p1210_p12, 1, 0 }
  0x38   : > { %s188_s29 = sshll.u32 %s181_s28, 4  ;;  %p1224_p10 = pnand %p880_p4, %p39_p6  ;;  %s1228_s29 = int_to_ptr.vmem [resolvable:$true] %s188_s29 }
  0x39   : > { %s1233_s12 = scalar_lea.hbm %s1411_s1, %s769_s6  ;;  %s178_s13 = scalar_lea.sflag [#allocation3], %s177_s5 }
  0x3a   : > { %s954_s14 = scalar_lea.hbm %s1221_s25, 64  ;;  %p956_p0 = pneg %p1224_p10 }
  0x3b   : > { %p955_p13 = scmp.ne.s32.totalorder %s1221_s25, %s954_s14  ;;  %s959_s8 = scalar_lea.hbm %s1410_s0, 256 }
  0x3c   : > { %p960_p7 = scmp.lt.u32.totalorder %s1221_s25, %s1410_s0  ;;  %p961_p9 = scmp.lt.u32.totalorder %s959_s8, %s954_s14 }
  0x3d   : > { %p957_p3 = pnand %p956_p0, %p955_p13  ;;  %p963_p2 = scmp.lt.u32.totalorder %s954_s14, %s1221_s25 }
  0x3e   : > { %p962_p11 = por %p961_p9, %p960_p7 }
  0x3f   : > { %p958_p5 = pneg %p957_p3 }
  0x40   : > { %p964_p1 = por %p963_p2, %p962_p11 }
  0x42   : > { %p965_p4 = pnand %p964_p1, %p958_p5 }
  0x44   : > { %968 = shalt.err (!%p965_p4)
}
  0x45   : > { %s969_s5 = scalar_lea.vmem %s1228_s29, 64  ;;  %s1093_s6 = smov [#allocation2]  }
  0x46   : > { %p970_p6 = scmp.ne.s32.totalorder %s1228_s29, %s969_s5  ;;  %s974_s10 = sshll.u32 %s1093_s6, 4  ;;  %s975_s10 = int_to_ptr.vmem [resolvable:$false] %s974_s10 }
  0x47   : > { %s976_s2 = scalar_lea.vmem %s975_s10, 128  ;;  %p977_p3 = scmp.lt.s32.totalorder %s1228_s29, %s975_s10 }
  0x48   : > { %p972_p8 = pnand %p970_p6, %p956_p0  ;;  %p978_p7 = scmp.lt.s32.totalorder %s976_s2, %s969_s5 }
  0x4a   : > { %p973_p13 = pneg %p972_p8  ;;  %p979_p9 = por %p978_p7, %p977_p3 }
  0x4c   : > { %p980_p11 = pnand %p979_p9, %p973_p13 }
  0x4e   : > { %983 = shalt.err (!%p980_p11)
}
  0x4f   : > { %871 = dma.hbm_to_vmem [thread:$0]  (!%p1224_p10), %s1221_s25, 64, %s1228_s29, %s178_s13  }
  0x50   : > { %s195_s11 = sand.u32 1, %s1088_s18   ;;  %s199_s14 = scalar_lea.vmem [#allocation5], %s1216_s7 }
  0x51   : > { %s206_s20 = sshll.u32 %s199_s14, 4  ;;  %s196_s26 = scalar_lea.sflag [#allocation6], %s195_s11  ;;  %s207_s20 = int_to_ptr.vmem [resolvable:$true] %s206_s20 }
  0x52   : > { %s984_s8 = scalar_lea.hbm %s1233_s12, 64  ;;  %s989_s6 = scalar_lea.hbm %s1411_s1, 256 }
  0x53   : > { %p985_p5 = scmp.ne.s32.totalorder %s1233_s12, %s984_s8  ;;  %p990_p4 = scmp.lt.u32.totalorder %s1233_s12, %s1411_s1 }
  0x54   : > { %p991_p6 = scmp.lt.u32.totalorder %s989_s6, %s984_s8  ;;  %p993_p13 = scmp.lt.u32.totalorder %s984_s8, %s1233_s12 }
  0x55   : > { %p987_p2 = pnand %p985_p5, %p956_p0 }
  0x56   : > { %p992_p8 = por %p991_p6, %p990_p4 }
  0x57   : > { %p988_p1 = pneg %p987_p2 }
  0x58   : > { %p994_p3 = por %p993_p13, %p992_p8 }
  0x5a   : > { %p995_p7 = pnand %p994_p3, %p988_p1 }
  0x5c   : > { %998 = shalt.err (!%p995_p7)
}
  0x5d   : > { %s999_s7 = scalar_lea.vmem %s207_s20, 64  ;;  %s1094_s25 = smov [#allocation5]  }
  0x5e   : > { %p1000_p9 = scmp.ne.s32.totalorder %s207_s20, %s999_s7  ;;  %s1004_s29 = sshll.u32 %s1094_s25, 4  ;;  %s1005_s29 = int_to_ptr.vmem [resolvable:$false] %s1004_s29 }
  0x5f   : > { %s1006_s13 = scalar_lea.vmem %s1005_s29, 128  ;;  %p1007_p2 = scmp.lt.s32.totalorder %s207_s20, %s1005_s29 }
  0x60   : > { %p1002_p11 = pnand %p1000_p9, %p956_p0  ;;  %p1008_p12 = scmp.lt.s32.totalorder %s1006_s13, %s999_s7 }
  0x62   : > { %p1003_p5 = pneg %p1002_p11  ;;  %p1009_p4 = por %p1008_p12, %p1007_p2 }
  0x64   : > { %p1010_p6 = pnand %p1009_p4, %p1003_p5 }
  0x66   : > { %1013 = shalt.err (!%p1010_p6)
}
  0x67   : > { %874 = dma.hbm_to_vmem [thread:$0]  (!%p1224_p10), %s1233_s12, 64, %s207_s20, %s196_s26  }
  0x68   : > { %p1428_p1 = scmp.ne.s32.totalorder %s1422_s23, 0 }
  0x69   : > { %s1284_s11 = sand.u32 (!%p1428_p1), 1, %s1080_s16   ;;  %p1429_p0 = scmp.ne.s32.totalorder (!%p1428_p1), %s1420_s21, 0 }
  0x6a   : > { %215 = sbr.rel (%p1428_p1) target bundleno = 1786 (0x6fa), region = 36  ;;  %s773_s14 = sshll.u32 (!%p1428_p1), %s1284_s11, 2 }
  0x6b   : > { %s218_s8 = scalar_lea.sflag (!%p1428_p1), [#allocation3], %s1284_s11  ;;  %s221_s28 = scalar_lea.vmem (!%p1428_p1), [#allocation2], %s773_s14 }
  0x71   : > { %1059 = dma.done.wait (%p1429_p0), %s218_s8, 64  }
  0x72   : > { %1061 = vsyncadd (%p1429_p0), %s218_s8, 4294967232  ;;  %s226_s9 = sand.u32 1, %s1148_s19   ;;  %s230_s23 = scalar_lea.vmem [#allocation5], %s773_s14 }
  0x73   : > { %s227_s12 = scalar_lea.sflag [#allocation6], %s226_s9 }
  0x74   : > { %1063 = dma.done.wait (%p1429_p0), %s227_s12, 64  }
  0x75   : > { %1065 = vsyncadd (%p1429_p0), %s227_s12, 4294967232  ;;  %p1430_p12 = scmp.eq.s32.totalorder %s1148_s19, 0 }
  0x77   : > { %1067 = dma.done.wait (%p1430_p12), [#allocation6], 256   ;;  %p1431_p10 = pmov %p1430_p12 }
  0x78   : > { %v1095_v0 = vmov 0.0   ;;  %vm1096_vm0 = vmmov 0   ;;  %vm275_vm1 = vcmask 1043456   ;;  %v265_v1 = vld [vmem:[%s230_s23] sm:$0xf]  ;;  %vm271_vm2 = vcmask 64512  }
  0x79   : > { %1069 = vsyncadd (%p1431_p10), [#allocation6], 4294967040  ;;  %806 = vmatprep.subr.bf16.mxu0 %v1095_v0  ;;  %808 = vmatprep.mubr.msk.bf16.mxu0 %vm1096_vm0, %v1095_v0  ;;  %v277_v2 = vsel %vm275_vm1, %v265_v1, 0  ;;  %v264_v3 = vld [vmem:[%s221_s28] sm:$0xf]  ;;  %v1312_v4 = vld [vmem:[#allocation7] sm:$0xff]  }
  0x7a   : > { %812 = vmatprep.subr.bf16.mxu1 %v1095_v0  ;;  %814 = vmatprep.mubr.msk.bf16.mxu1 %vm1096_vm0, %v1095_v0  ;;  %vm332_vm3 = vcmask 130048   ;;  %v1322_v10 = vld [vmem:[%s1413_s3] ss:$0 sm:$0xff]  ;;  %s1097_s26 = smov 96   ;;  %v1325_v11 = vld [vmem:[#allocation7 + $0x8] sm:$0xff]   ;;  %s1098_s5 = smov 64  }
  0x7b   : > { %807 = vmatpush3.bf16.msra.mxu0 %v277_v2  ;;  %813 = vmatpush3.bf16.msra.mxu1 %v1312_v4  ;;  %vm436_vm4 = vcmask 261120   ;;  %s1099_s6 = smov 48   ;;  %s1100_s10 = smov 16   ;;  %vm650_vm5 = vcmask 162816  }
  0x7c   : > { %818 = vmatprep.subr.bf16.mxu0 %v1095_v0  ;;  %824 = vmatprep.subr.bf16.mxu1 %v1095_v0  ;;  %s786_s2 = sshll.u32 %s1148_s19, 4  ;;  %s262_s7 = scalar_lea.vmem [#allocation8], %s1284_s11 }
  0x7d   : > { %427 = vrot.lane.b32.xlu0 %v1312_v4, %s1097_s26  ;;  %433 = vrot.lane.b32.xlu1 %v1322_v10, %s1097_s26  ;;  %s666_s25 = sshll.u32 %s262_s7, 4  ;;  %s1367_s14 = scalar_lea.hbm %s1414_s4, %s786_s2  ;;  %s1369_s25 = int_to_ptr.vmem [resolvable:$true] %s666_s25 }
  0x7e   : > { %809 = vmatmul.mubr.msk.bf16.vlgmr.msra.gmra.mrb[0].mxu0 %vm271_vm2, %v264_v3  ;;  %s654_s8 = scalar_lea.sflag [#allocation4], %s1284_s11  ;;  %s1014_s19 = scalar_lea.vmem %s1369_s25, 16 }
  0x7f   : > { %820 = vmatprep.mubr.msk.bf16.mxu0 %vm1096_vm0, %v1095_v0  ;;  %p1015_p8 = scmp.ne.s32.totalorder %s1369_s25, %s1014_s19  ;;  %p1432_p13 = scmp.ne.s32.totalorder %s1426_s30, 0 }
  0x80   : > { %s1101_s28 = smov [#allocation8]  }
  0x81   : > { %429 = vrot.lane.b32.xlu0 %v1325_v11, %s1097_s26  ;;  %489 = vrot.lane.b32.xlu1 %v1312_v4, %s1098_s5  ;;  %p1016_p3 = pnand %p1015_p8, %p1432_p13  ;;  %s1018_s9 = sshll.u32 %s1101_s28, 4  ;;  %s1019_s9 = int_to_ptr.vmem [resolvable:$false] %s1018_s9 }
  0x82   : > { %s1020_s12 = scalar_lea.vmem %s1019_s9, 32  ;;  %p1021_p9 = scmp.lt.s32.totalorder %s1369_s25, %s1019_s9 }
  0x83   : > { %p1017_p7 = pneg %p1016_p3  ;;  %p1022_p11 = scmp.lt.s32.totalorder %s1020_s12, %s1014_s19 }
  0x85   : > { %491 = vrot.lane.b32.xlu0 %v1325_v11, %s1098_s5  ;;  %495 = vrot.lane.b32.xlu1 %v1322_v10, %s1098_s5  ;;  %p1023_p5 = por %p1022_p11, %p1021_p9 }
  0x87   : > { %p1024_p2 = pnand %p1023_p5, %p1017_p7 }
  0x89   : > { %542 = vrot.lane.b32.xlu0 %v1312_v4, %s1099_s6  ;;  %593 = vrot.lane.b32.xlu1 %v1312_v4, %s1100_s10 }
  0x8d   : > { %545 = vrot.lane.b32.xlu0 %v1322_v10, %s1099_s6  ;;  %595 = vrot.lane.b32.xlu1 %v1325_v11, %s1100_s10 }
  0x91   : > { %599 = vrot.lane.b32.xlu0 %v1322_v10, %s1100_s10 }
  0xef   : > { %v428_v12 = vpop.permute.xlu0 %427  ;;  %v434_v27 = vpop.permute.xlu1 %433 }
  0xf3   : > { %v430_v17 = vpop.permute.xlu0 %429  ;;  %v490_v28 = vpop.permute.xlu1 %489 }
  0xf7   : > { %v492_v29 = vpop.permute.xlu0 %491  ;;  %v496_v45 = vpop.permute.xlu1 %495 }
  0xfb   : > { %v543_v44 = vpop.permute.xlu0 %542  ;;  %v594_v46 = vpop.permute.xlu1 %593 }
  0xff   : > { %v596_v53 = vpop.permute.xlu1 %595  ;;  %v546_v54 = vpop.permute.xlu0 %545 }
 0x103   : > { %v600_v62 = vpop.permute.xlu0 %599 }
 0x151   : > { %v313_v5 = vpop.f32.mrb[0].mxu0 }
 0x152   : > { %v319_v6 = vpack.c.bf16 %v313_v5, %v313_v5  ;;  %v810_v7 = vpop.f32.mrb[1].mxu0 }
 0x153   : > { %v316_v8 = vpop.f32.mrb[2].mxu0 }
 0x154   : > { %v811_v9 = vpop.f32.mrb[3].mxu0  ;;  %815 = vmatmul.mubr.msk.bf16.vlgmr.msra.gmra.mrb[0].mxu1 %vm332_vm3, %v319_v6 }
 0x155   : > { %828 = vmatprep.mubr.msk.bf16.mxu1 %vm1096_vm0, %v1095_v0  ;;  %825 = vmatpush3.bf16.msra.mxu1 %v428_v12 }
 0x156   : > { %826 = vmatprep.subr.bf16.mxu1 %v1095_v0 }
 0x159   : > { %827 = vmatpush3.bf16.msra.mxu1 %v430_v17 }
 0x15a   : > { %840 = vmatprep.subr.bf16.mxu1 %v1095_v0 }
 0x227   : > { %v370_v13 = vpop.f32.mrb[0].mxu1 }
 0x228   : > { %v371_v14 = vadd.f32 %v1322_v10, %v370_v13  ;;  %v816_v15 = vpop.f32.mrb[1].mxu1 }
 0x229   : > { %v373_v16 = vpop.f32.mrb[2].mxu1 }
 0x22a   : > { %v376_v18 = vmax.f32 %v371_v14, 0.0  ;;  %v817_v19 = vpop.f32.mrb[3].mxu1 }
 0x22c   : > { %v377_v20 = vpack.c.bf16 %v376_v18, %v376_v18 }
 0x22e   : > { %v379_v21 = vsel %vm275_vm1, %v377_v20, 0 }
 0x22f   : > { %819 = vmatpush3.bf16.msra.mxu0 %v379_v21 }
 0x230   : > { %832 = vmatprep.subr.bf16.mxu0 %v1095_v0 }
 0x232   : > { %821 = vmatmul.mubr.msk.bf16.vlgmr.msra.gmra.mrb[4].mxu0 %vm271_vm2, %v264_v3 }
 0x233   : > { %836 = vmatprep.mubr.msk.bf16.mxu0 %vm1096_vm0, %v1095_v0  ;;  %833 = vmatpush3.bf16.msra.mxu0 %v490_v28 }
 0x234   : > { %834 = vmatprep.subr.bf16.mxu0 %v1095_v0 }
 0x237   : > { %835 = vmatpush3.bf16.msra.mxu0 %v492_v29 }
 0x238   : > { %846 = vmatprep.subr.bf16.mxu0 %v1095_v0 }
 0x305   : > { %v415_v22 = vpop.f32.mrb[4].mxu0 }
 0x306   : > { %v421_v23 = vpack.c.bf16 %v415_v22, %v415_v22  ;;  %v822_v24 = vpop.f32.mrb[5].mxu0 }
 0x307   : > { %v418_v25 = vpop.f32.mrb[6].mxu0 }
 0x308   : > { %829 = vmatmul.mubr.msk.bf16.vlgmr.msra.gmra.mrb[4].mxu1 %vm436_vm4, %v421_v23  ;;  %v823_v26 = vpop.f32.mrb[7].mxu0 }
 0x309   : > { %842 = vmatprep.mubr.msk.bf16.mxu1 %vm1096_vm0, %v1095_v0  ;;  %841 = vmatpush3.bf16.msra.mxu1 %v543_v44 }
 0x3db   : > { %v474_v30 = vpop.f32.mrb[4].mxu1 }
 0x3dc   : > { %v475_v31 = vadd.f32 %v474_v30, %v434_v27  ;;  %v830_v32 = vpop.f32.mrb[5].mxu1 }
 0x3dd   : > { %v477_v33 = vpop.f32.mrb[6].mxu1 }
 0x3de   : > { %v480_v34 = vmax.f32 %v475_v31, 0.0  ;;  %v831_v35 = vpop.f32.mrb[7].mxu1 }
 0x3e0   : > { %v481_v36 = vsel %vm436_vm4, %v480_v34, -inf }
 0x3e1   : > { %v482_v37 = vrot.slane %v481_v36, 4 }
 0x3e3   : > { %v483_v38 = vmax.f32 %v481_v36, %v482_v37 }
 0x3e5   : > { %v484_v39 = vrot.slane %v483_v38, 2 }
 0x3e7   : > { %v485_v40 = vmax.f32 %v483_v38, %v484_v39 }
 0x3e9   : > { %v486_v41 = vrot.slane %v485_v40, 1 }
 0x3eb   : > { %v487_v42 = vmax.f32 %v485_v40, %v486_v41 }
 0x3ed   : > { %v488_v43 = vpack.c.bf16 %v487_v42, %v487_v42 }
 0x3ef   : > { %837 = vmatmul.mubr.msk.bf16.vlgmr.msra.gmra.mrb[8].mxu0 %vm436_vm4, %v488_v43 }
 0x3f0   : > { %850 = vmatprep.mubr.msk.bf16.mxu0 %vm1096_vm0, %v1095_v0  ;;  %847 = vmatpush3.bf16.msra.mxu0 %v594_v46 }
 0x3f1   : > { %848 = vmatprep.subr.bf16.mxu0 %v1095_v0 }
 0x3f4   : > { %849 = vmatpush3.bf16.msra.mxu0 %v596_v53 }
 0x4c2   : > { %v535_v47 = vpop.f32.mrb[8].mxu0 }
 0x4c3   : > { %v536_v48 = vadd.f32 %v535_v47, %v496_v45  ;;  %v838_v49 = vpop.f32.mrb[9].mxu0 }
 0x4c4   : > { %v538_v50 = vpop.f32.mrb[10].mxu0 }
 0x4c5   : > { %v541_v51 = vpack.c.bf16 %v536_v48, %v536_v48  ;;  %v839_v52 = vpop.f32.mrb[11].mxu0 }
 0x4c7   : > { %843 = vmatmul.mubr.msk.bf16.vlgmr.msra.gmra.mrb[8].mxu1 %vm332_vm3, %v541_v51 }
 0x59a   : > { %v585_v55 = vpop.f32.mrb[8].mxu1 }
 0x59b   : > { %v586_v56 = vadd.f32 %v585_v55, %v546_v54  ;;  %v844_v57 = vpop.f32.mrb[9].mxu1 }
 0x59c   : > { %v588_v58 = vpop.f32.mrb[10].mxu1 }
 0x59d   : > { %v591_v59 = vmax.f32 %v586_v56, 0.0  ;;  %v845_v60 = vpop.f32.mrb[11].mxu1 }
 0x59f   : > { %v592_v61 = vpack.c.bf16 %v591_v59, %v591_v59 }
 0x5a1   : > { %851 = vmatmul.mubr.msk.bf16.vlgmr.msra.gmra.mrb[12].mxu0 %vm436_vm4, %v592_v61 }
 0x674   : > { %v639_v63 = vpop.f32.mrb[12].mxu0 }
 0x675   : > { %v640_v0 = vadd.f32 %v639_v63, %v600_v62  ;;  %v852_v1 = vpop.f32.mrb[13].mxu0 }
 0x676   : > { %v642_v2 = vpop.f32.mrb[14].mxu0 }
 0x677   : > { %646 = vrot.lane.b32.xlu1 %v640_v0, %s1100_s10  ;;  %v853_v3 = vpop.f32.mrb[15].mxu0 }
 0x6e9   : > { %v647_v4 = vpop.permute.xlu1 %646 }
 0x6ea   : > { %v649_v5 = vsel %vm332_vm3, %v536_v48, %v647_v4 }
 0x6eb   : > { %v651_v6 = vsel %vm650_vm5, %v649_v5, 0.0 }
 0x6ec   : > { %652 = vst [vmem:[%s262_s7] sm:$0x1] %v651_v6 }
 0x6ed   : > { %1027 = shalt.err (!%p1024_p2)
}
 0x6ee   : > { %s1028_s11 = scalar_lea.hbm %s1367_s14, 16  ;;  %s1032_s20 = scalar_lea.hbm %s1414_s4, 64 }
 0x6ef   : > { %p1029_p4 = scmp.ne.s32.totalorder %s1367_s14, %s1028_s11  ;;  %p1033_p0 = scmp.lt.u32.totalorder %s1367_s14, %s1414_s4 }
 0x6f0   : > { %p1034_p12 = scmp.lt.u32.totalorder %s1032_s20, %s1028_s11  ;;  %p1036_p8 = scmp.lt.u32.totalorder %s1028_s11, %s1367_s14 }
 0x6f1   : > { %p1030_p6 = pnand %p1029_p4, %p1432_p13 }
 0x6f2   : > { %p1035_p10 = por %p1034_p12, %p1033_p0 }
 0x6f3   : > { %p1031_p1 = pneg %p1030_p6 }
 0x6f4   : > { %p1037_p3 = por %p1036_p8, %p1035_p10 }
 0x6f6   : > { %p1038_p7 = pnand %p1037_p3, %p1031_p1 }
 0x6f8   : > { %1041 = shalt.err (!%p1038_p7)
}
 0x6f9   : > { %862 = dma.vmem_to_hbm [thread:$0]  (%p1432_p13), %s1369_s25, 16, %s1367_s14, %s654_s8  }
 0x6fa PF: > { %p882_p9 = scmp.ge.s32.totalorder %s1088_s18, 2  ;;  %s678_s6 = sand.u32 1, %s1076_s15  }
 0x6fb   : > { %p1433_p11 = scmp.ne.s32.totalorder %s1421_s22, 0  ;;  %s679_s10 = scalar_lea.sflag [#allocation4], %s678_s6 }
 0x6fd   : > { %p876_p5 = pnand %p882_p9, %p1433_p11 }
 0x6ff   : > { %1071 = dma.done.wait (!%p876_p5), %s679_s10, 16  }
 0x700   : > { %1073 = vsyncadd (!%p876_p5), %s679_s10, 4294967280  ;;  %p20_p2 = scmp.ge.s32.totalorder %s1180_s27, 6   ;;  %s1434_s15 = smov %s1080_s16 }
 0x701   : > { %s1435_s16 = smov %s1084_s17  ;;  %s1436_s17 = smov %s1206_s24 }
 0x702   : > { %s1437_s18 = smov %s1180_s27  ;;  %22 = sbr.rel (!%p20_p2) target bundleno = 9 (0x9), region = 98 }
 0x709   :  { %683 = vsyncpa [#allocation3], 1 }
 0x70a   :  { %685 = vsyncpa [#allocation3 + $0x1], 1 }
 0x70b   :  { %686 = vsyncpa [#allocation6], 1 }
 0x70c   :  { %688 = vsyncpa [#allocation6 + $0x1], 1 }
 0x70d   :  { %689 = vsyncpa [#allocation4], 1 }
 0x70e   :  { %691 = vsyncpa [#allocation4 + $0x1], 1 }

</bundles_post_ra>
